<compile_context>
chip_gen: v7x
topology: tpu7x:2x2x1
jax: 0.10.0
libtpu: 0.0.40
codegen_flags: <defaults>
</compile_context>

<pallas_src>
import jax
import jax.numpy as jnp
from jax.experimental import pallas as pl
from jax.experimental.pallas import tpu as pltpu

D1 = 1920   # x1 feature size
D2 = 68     # flattened x2 feature size
OUT = 5     # number of classes


def _classifier_kernel(x1_ref, x2_ref, w1_ref, w2_ref, b_ref, o_ref):
    # Two MXU matmuls (split of the concatenated linear) + bias.
    # bf16 operands, f32 accumulation on the MXU.
    acc = jnp.dot(x1_ref[...], w1_ref[...], preferred_element_type=jnp.float32)
    acc = acc + jnp.dot(x2_ref[...], w2_ref[...],
                        preferred_element_type=jnp.float32)
    o_ref[...] = (acc + b_ref[...]).astype(o_ref.dtype)


def _round_up(n, m):
    return ((n + m - 1) // m) * m


def _pick_batch_tile(B):
    """Rows per grid step.

    - <=1024 rows: ~9 MiB double-buffered bf16 footprint, fits the default
      scoped VMEM on v5e/v6e/v7x alike (no vmem_limit override needed).
    - Also capped at ceil(B/2) (rounded up to the 8-sublane granule) so the
      grid has >=2 steps and the "parallel" batch axis can shard across both
      TensorCores on v7x.
    """
    if B <= 8:
        return B            # block == full dim (legal for any B)
    return min(1024, _round_up(pl.cdiv(B, 2), 8))


def prepare_params(weight, bias):
    """One-time (out-of-hot-path) parameter preparation.

    weight: (1988, 5)  -- (in_features, out_features), i.e. PyTorch weight.T
    bias:   (5,)
    Returns bf16 split weights (w1, w2) and an f32 (1, 5) bias row.
    """
    w = weight.astype(jnp.bfloat16)
    w1 = w[:D1]                                   # (1920, 5) bf16
    w2 = w[D1:]                                   # (  68, 5) bf16
    b = bias.astype(jnp.float32).reshape(1, OUT)  # (1, 5) f32
    return w1, w2, b


def ni_ensemble_net(x1, x2, w1, w2, b):
    """Pallas forward pass of NIEnsembleNet.

    x1: (B, 1920) bfloat16 (stored upstream in bf16; f32 also accepted)
    x2: (B, ...)  flattens to (B, 68); cast to x1.dtype (tiny)
    w1: (1920, 5), w2: (68, 5)  -- from prepare_params (bf16)
    b:  (1, 5) float32
    Returns (B, 5) float32.
    """
    B = x1.shape[0]
    x2f = x2.reshape(B, -1).astype(x1.dtype)   # glue: flatten; tiny (B x 68)
    assert x1.shape[1] == D1 and x2f.shape[1] == D2
    assert w1.shape == (D1, OUT) and w2.shape == (D2, OUT) and b.shape == (1, OUT)

    tb = _pick_batch_tile(B)
    grid = (pl.cdiv(B, tb),)

    in_bytes = jnp.dtype(x1.dtype).itemsize
    w_bytes = jnp.dtype(w1.dtype).itemsize
    cost = pl.CostEstimate(
        # MXU computes a full 128-lane result regardless of OUT=5.
        flops=2 * B * (D1 + D2) * 128,
        transcendentals=0,
        bytes_accessed=(B * D1 * in_bytes            # x1 read
                        + B * D2 * in_bytes          # x2 read
                        + (D1 + D2) * OUT * w_bytes  # weights read
                        + OUT * 4                    # bias read
                        + B * OUT * 4),              # output write
    )

    out = pl.pallas_call(
        _classifier_kernel,
        out_shape=jax.ShapeDtypeStruct((B, OUT), jnp.float32),
        grid=grid,
        in_specs=[
            pl.BlockSpec((tb, D1), lambda i: (i, 0)),   # x1: tiled over batch
            pl.BlockSpec((tb, D2), lambda i: (i, 0)),   # x2 (flattened)
            pl.BlockSpec((D1, OUT), lambda i: (0, 0)),  # w1: VMEM-resident, unpadded
            pl.BlockSpec((D2, OUT), lambda i: (0, 0)),  # w2: VMEM-resident, unpadded
            pl.BlockSpec((1, OUT), lambda i: (0, 0)),   # bias: VMEM-resident
        ],
        # Full-last-dim output block (5 == full dim): no padded (B,128) HBM
        # write and no post-kernel slice pass.
        out_specs=pl.BlockSpec((tb, OUT), lambda i: (i, 0)),
        compiler_params=pltpu.CompilerParams(
            dimension_semantics=("parallel",),
        ),
        cost_estimate=cost,
    )(x1, x2f, w1, w2, b)

    return out


def init_params(key):
    """Deterministic init matching nn.Linear(1988, 5) fan-in uniform."""
    kw, kb = jax.random.split(key)
    fan_in = D1 + D2
    bound = 1.0 / jnp.sqrt(float(fan_in))
    # Stored as (in_features, out_features) = PyTorch weight transposed.
    weight = jax.random.uniform(kw, (fan_in, OUT), jnp.float32, -bound, bound)
    bias = jax.random.uniform(kb, (OUT,), jnp.float32, -bound, bound)
    return weight, bias


if __name__ == "__main__":
    key = jax.random.PRNGKey(0)
    k_param, k_x1, k_x2 = jax.random.split(key, 3)

    B = 2
    weight, bias = init_params(k_param)
    # Inputs stored upstream in bf16 (the bandwidth win); x2 given in an
    # un-flattened per-sample shape (2, 4, 17) -> 68 features.
    x1 = jax.random.normal(k_x1, (B, D1), jnp.float32).astype(jnp.bfloat16)
    x2 = jax.random.normal(k_x2, (B, 4, 17), jnp.float32).astype(jnp.bfloat16)

    # One-time parameter prep (outside the per-call hot path).
    w1, w2, b = prepare_params(weight, bias)

    out = ni_ensemble_net(x1, x2, w1, w2, b)
    out = jax.block_until_ready(out)

    # Pure-JAX reference (concat + dense) on the same bf16-valued operands,
    # accumulated in f32 — same semantics as the PyTorch module.
    x_cat = jnp.concatenate(
        [x1.astype(jnp.float32), x2.reshape(B, -1).astype(jnp.float32)], axis=1)
    ref = x_cat @ jnp.concatenate([w1, w2], axis=0).astype(jnp.float32) + b
    assert out.shape == (B, OUT)
    assert jnp.allclose(out, ref, atol=1e-3, rtol=1e-3)

    print("KERNEL_OK")
</pallas_src>

<mosaic_0001>
module attributes {stable_mosaic.version = 11 : i64} {
  func.func @_classifier_kernel(%arg0: i32, %arg1: memref<2x1920xbf16, #tpu.memory_space<vmem>>, %arg2: memref<2x68xbf16, #tpu.memory_space<vmem>>, %arg3: memref<1920x5xbf16, #tpu.memory_space<vmem>>, %arg4: memref<68x5xbf16, #tpu.memory_space<vmem>>, %arg5: memref<1x5xf32, #tpu.memory_space<vmem>>, %arg6: memref<2x5xf32, #tpu.memory_space<vmem>>) attributes {dimension_semantics = [#tpu.dimension_semantics<parallel>], iteration_bounds = array<i64: 1>, scalar_prefetch = 0 : i64, scratch_operands = 0 : i64, tpu.core_type = #tpu.core_type<tc>, window_params = [{transform_indices = @transform_0, window_bounds = array<i64: 2, 1920>}, {transform_indices = @transform_1, window_bounds = array<i64: 2, 68>}, {pipeline_mode = #tpu.pipeline_mode<synchronous>, transform_indices = @transform_2, window_bounds = array<i64: 1920, 5>}, {pipeline_mode = #tpu.pipeline_mode<synchronous>, transform_indices = @transform_3, window_bounds = array<i64: 68, 5>}, {pipeline_mode = #tpu.pipeline_mode<synchronous>, transform_indices = @transform_4, window_bounds = array<i64: 1, 5>}, {transform_indices = @transform_5, window_bounds = array<i64: 2, 5>}]} {
    %c0 = arith.constant 0 : index
    %c0_0 = arith.constant 0 : index
    %0 = vector.load %arg1[%c0, %c0_0] : memref<2x1920xbf16, #tpu.memory_space<vmem>>, vector<2x1920xbf16>
    %c0_1 = arith.constant 0 : index
    %c0_2 = arith.constant 0 : index
    %1 = vector.load %arg3[%c0_1, %c0_2] : memref<1920x5xbf16, #tpu.memory_space<vmem>>, vector<1920x5xbf16>
    %cst = arith.constant dense<0.000000e+00> : vector<2x5xf32>
    %2 = tpu.matmul %0, %1, %cst {dimension_numbers = #tpu.dot_dimension_numbers<[1], [0], [0], [1], [0, 0, 1, 1], [], []>} : vector<2x1920xbf16>, vector<1920x5xbf16>, vector<2x5xf32> -> vector<2x5xf32>
    %c0_3 = arith.constant 0 : index
    %c0_4 = arith.constant 0 : index
    %3 = vector.load %arg2[%c0_3, %c0_4] : memref<2x68xbf16, #tpu.memory_space<vmem>>, vector<2x68xbf16>
    %c0_5 = arith.constant 0 : index
    %c0_6 = arith.constant 0 : index
    %4 = vector.load %arg4[%c0_5, %c0_6] : memref<68x5xbf16, #tpu.memory_space<vmem>>, vector<68x5xbf16>
    %cst_7 = arith.constant dense<0.000000e+00> : vector<2x5xf32>
    %5 = tpu.matmul %3, %4, %cst_7 {dimension_numbers = #tpu.dot_dimension_numbers<[1], [0], [0], [1], [0, 0, 1, 1], [], []>} : vector<2x68xbf16>, vector<68x5xbf16>, vector<2x5xf32> -> vector<2x5xf32>
    %6 = arith.addf %2, %5 : vector<2x5xf32>
    %c0_8 = arith.constant 0 : index
    %c0_9 = arith.constant 0 : index
    %7 = vector.load %arg5[%c0_8, %c0_9] : memref<1x5xf32, #tpu.memory_space<vmem>>, vector<1x5xf32>
    %8 = vector.broadcast %7 : vector<1x5xf32> to vector<2x5xf32>
    %9 = arith.addf %6, %8 : vector<2x5xf32>
    %c0_10 = arith.constant 0 : index
    %c0_11 = arith.constant 0 : index
    %10 = vector.load %arg6[%c0_10, %c0_11] : memref<2x5xf32, #tpu.memory_space<vmem>>, vector<2x5xf32>
    tpu.vector_store %arg6[%c0_10, %c0_11], %9 {strides = array<i32>} : memref<2x5xf32, #tpu.memory_space<vmem>>, vector<2x5xf32>,
    return
  }
  func.func @transform_0(%arg0: i32) -> (i32, i32) {
    %c0_i32 = arith.constant 0 : i32
    %c0_i32_0 = arith.constant 0 : i32
    return %arg0, %c0_i32 : i32, i32
  }
  func.func @transform_1(%arg0: i32) -> (i32, i32) {
    %c0_i32 = arith.constant 0 : i32
    %c0_i32_0 = arith.constant 0 : i32
    return %arg0, %c0_i32 : i32, i32
  }
  func.func @transform_2(%arg0: i32) -> (i32, i32) {
    %c0_i32 = arith.constant 0 : i32
    %c0_i32_0 = arith.constant 0 : i32
    %c0_i32_1 = arith.constant 0 : i32
    return %c0_i32, %c0_i32_0 : i32, i32
  }
  func.func @transform_3(%arg0: i32) -> (i32, i32) {
    %c0_i32 = arith.constant 0 : i32
    %c0_i32_0 = arith.constant 0 : i32
    %c0_i32_1 = arith.constant 0 : i32
    return %c0_i32, %c0_i32_0 : i32, i32
  }
  func.func @transform_4(%arg0: i32) -> (i32, i32) {
    %c0_i32 = arith.constant 0 : i32
    %c0_i32_0 = arith.constant 0 : i32
    %c0_i32_1 = arith.constant 0 : i32
    return %c0_i32, %c0_i32_0 : i32, i32
  }
  func.func @transform_5(%arg0: i32) -> (i32, i32) {
    %c0_i32 = arith.constant 0 : i32
    %c0_i32_0 = arith.constant 0 : i32
    return %arg0, %c0_i32 : i32, i32
  }
}

</mosaic_0001>

<bundles_post_ra>
// kernel: tpu_custom_call.1
= control target key start
LH: loop header
LB: loop body
LE: loop exit
PB: predicated region body
PF: predicated region fallthrough
CT: control target
= control target key end

     0   :  { %v2012_v1 = vmov 0.0   ;;  %vm2013_vm0 = vmmov 0   ;;  %vm305_vm1 = vcmask 1041408   ;;  %vm301_vm2 = vcmask 556032   ;;  %s2486_s0 = inlined_call_operand.vmem [shape: bf16[2,1920], index: 0, kind: input, shape index: {}]   ;;  %s2487_s1 = inlined_call_operand.vmem [shape: bf16[2,68], index: 1, kind: input, shape index: {}]   ;;  %s2488_s2 = inlined_call_operand.vmem [shape: bf16[1920,5], index: 2, kind: input, shape index: {}]   ;;  %s2489_s3 = inlined_call_operand.vmem [shape: bf16[68,5], index: 3, kind: input, shape index: {}]   ;;  %s2490_s4 = inlined_call_operand.vmem [shape: f32[1,5], index: 4, kind: input, shape index: {}]   ;;  %s2491_s5 = inlined_call_operand.hbm [shape: f32[2,5], index: 5, kind: output, shape index: {}]  }
   0x1   :  { %v1861_v0 = vld [vmem:[%s2489_s3] sm:$0xff]   ;;  %1823 = vmatprep.subr.bf16.mxu0 %v2012_v1  ;;  %v1864_v4 = vld [vmem:[%s2489_s3 + $0x8] sm:$0xff]   ;;  %1833 = vmatprep.mubr.msk.bf16.mxu0 %vm2013_vm0, %v2012_v1  ;;  %v1867_v7 = vld [vmem:[%s2489_s3 + $0x10] sm:$0xff]   ;;  %v355_v26 = vlaneseq  ;;  %v2014_v34 = vmov 1966171168  }
   0x2   :  { %v1862_v2 = vld [vmem:[%s2488_s2 + $0x40] sm:$0xff]   ;;  %1824 = vmatpush3.bf16.msra.mxu0 %v1861_v0  ;;  %v1865_v5 = vld [vmem:[%s2488_s2 + $0x48] sm:$0xff]   ;;  %v1868_v8 = vld [vmem:[%s2488_s2 + $0x50] sm:$0xff]   ;;  %v353_v35 = vunpack.c.l.s4 %v2014_v34 }
   0x3   :  { %v1863_v3 = vld [vmem:[%s2488_s2] sm:$0xff]   ;;  %1660 = vmatprep.subr.bf16.mxu1 %v1862_v2  ;;  %1825 = vmatprep.subr.bf16.mxu0 %v2012_v1  ;;  %v1866_v6 = vld [vmem:[%s2488_s2 + $0x8] sm:$0xff]   ;;  %v1869_v9 = vld [vmem:[%s2488_s2 + $0x10] sm:$0xff]   ;;  %v356_v31 = vshrl.u32 %v355_v26, 7 }
   0x4   :  { %1661 = vmatpush3.bf16.msra.mxu1 %v1863_v3  ;;  %v1870_v10 = vld [vmem:[%s2489_s3 + $0x18] sm:$0xff]   ;;  %v1873_v13 = vld [vmem:[%s2489_s3 + $0x20] ss:$0 sps:$4 sm:$0x33]   ;;  %v1877_v19 = vld [vmem:[%s2488_s2 + $0x68] sm:$0xff]   ;;  %v354_v38 = vunpack.c.0.s8 %v353_v35 }
   0x5   :  { %1662 = vmatprep.subr.bf16.mxu1 %v1865_v5  ;;  %v1871_v11 = vld [vmem:[%s2488_s2 + $0x58] sm:$0xff]   ;;  %v1874_v14 = vld [vmem:[%s2488_s2 + $0x60] sm:$0xff]   ;;  %v307_v16 = vsel %vm305_vm1, %v1873_v13, 0  ;;  %v1879_v21 = vld [vmem:[%s2488_s2 + $0x28] sm:$0xff]  }
   0x6   :  { %1826 = vmatpush3.bf16.msra.mxu0 %v1864_v4  ;;  %v1872_v12 = vld [vmem:[%s2488_s2 + $0x18] sm:$0xff]   ;;  %v1875_v15 = vld [vmem:[%s2488_s2 + $0x20] sm:$0xff]   ;;  %v1880_v22 = vld [vmem:[%s2488_s2 + $0xc8] sm:$0xff]   ;;  %v2149_v40 = vsub.s32 %v354_v38, %v356_v31 }
   0x7   :  { %1827 = vmatprep.subr.bf16.mxu0 %v2012_v1  ;;  %v1876_v17 = vld [vmem:[%s2488_s2 + $0xc0] sm:$0xff]   ;;  %v1881_v23 = vld [vmem:[%s2488_s2 + $0x70] sm:$0xff]   ;;  %v1882_v24 = vld [vmem:[%s2488_s2 + $0x88] sm:$0xff]  }
   0x8   :  { %1663 = vmatpush3.bf16.msra.mxu1 %v1866_v6  ;;  %v264_v18 = vld [vmem:[%s2487_s1] sm:$0x1]  ;;  %v1883_v25 = vld [vmem:[%s2488_s2 + $0x30] sm:$0xff]   ;;  %v1885_v28 = vld [vmem:[%s2488_s2 + $0x78] sm:$0xff]  }
   0x9   :  { %1664 = vmatprep.subr.bf16.mxu1 %v1868_v8  ;;  %v1878_v20 = vld [vmem:[%s2488_s2 + $0x80] sm:$0xff]   ;;  %v1884_v27 = vld [vmem:[%s2488_s2 + $0xd0] sm:$0xff]   ;;  %v1887_v30 = vld [vmem:[%s2488_s2 + $0x38] sm:$0xff]  }
   0xa   :  { %1828 = vmatpush3.bf16.msra.mxu0 %v1867_v7  ;;  %v1886_v29 = vld [vmem:[%s2488_s2 + $0x90] sm:$0xff]   ;;  %v22_v32 = vld [vmem:[%s2486_s0] sm:$0xff]  ;;  %v1889_v33 = vld [vmem:[%s2488_s2 + $0xd8] sm:$0xff]  }
   0xb   :  { %1829 = vmatprep.subr.bf16.mxu0 %v2012_v1  ;;  %v1890_v36 = vld [vmem:[%s2488_s2 + $0x98] sm:$0xff]   ;;  %v351_v37 = vcombine.high %v22_v32, %v22_v32  ;;  %v1891_v39 = vld [vmem:[%s2488_s2 + $0x140] sm:$0xff]   ;;  %v358_v42 = vrot.slane %v22_v32, %v2149_v40  ;;  %v1897_v46 = vld [vmem:[%s2488_s2 + $0xe8] sm:$0xff]  }
   0xc   :  { %1665 = vmatpush3.bf16.msra.mxu1 %v1869_v9  ;;  %v1893_v41 = vld [vmem:[%s2488_s2 + $0xe0] sm:$0xff]   ;;  %v1898_v51 = vld [vmem:[%s2488_s2 + $0xa8] sm:$0xff]   ;;  %v1901_v54 = vld [vmem:[%s2488_s2 + $0xf0] sm:$0xff]  }
   0xd   :  { %1666 = vmatprep.subr.bf16.mxu1 %v1871_v11  ;;  %v1894_v43 = vld [vmem:[%s2488_s2 + $0xa0] sm:$0xff]   ;;  %v2159_v44 = vrot.slane %v351_v37, %v2149_v40  ;;  %v366_v45 = vcombine.high %v358_v42, %v358_v42  ;;  %v374_v48 = vrot.slane %v358_v42, %v2149_v40  ;;  %v1895_v52 = vld [vmem:[%s2488_s2 + $0x148] sm:$0xff]   ;;  %v1902_v57 = vld [vmem:[%s2488_s2 + $0xb0] sm:$0xff]  }
   0xe   :  { %1830 = vmatpush3.bf16.msra.mxu0 %v1870_v10  ;;  %v1892_v49 = vld [vmem:[%s2488_s2 + $0x100] sm:$0xff]   ;;  %v1896_v56 = vld [vmem:[%s2488_s2 + $0x108] sm:$0xff]   ;;  %v1899_v58 = vld [vmem:[%s2488_s2 + $0x150] sm:$0xff]  }
   0xf   :  { %1831 = vmatprep.subr.bf16.mxu0 %v2012_v1  ;;  %v367_v47 = vcombine.high %v2159_v44, %v2159_v44  ;;  %v388_v50 = vrot.slane %v366_v45, %v2149_v40  ;;  %v1905_v59 = vld [vmem:[%s2488_s2 + $0xf8] sm:$0xff]   ;;  %v1900_v60 = vld [vmem:[%s2488_s2 + $0x110] sm:$0xff]   ;;  %v1909_v63 = vld [vmem:[%s2488_s2 + $0x1c0] sm:$0xff]   ;;  %v396_v0 = vcombine.high %v374_v48, %v374_v48 }
  0x10   :  { %1667 = vmatpush3.bf16.msra.mxu1 %v1872_v12  ;;  %v1906_v61 = vld [vmem:[%s2488_s2 + $0xb8] sm:$0xff]   ;;  %v1911_v3 = vld [vmem:[%s2488_s2 + $0x180] sm:$0xff]   ;;  %v1913_v5 = vld [vmem:[%s2488_s2 + $0x1c8] sm:$0xff]  }
  0x11   :  { %1668 = vmatprep.subr.bf16.mxu1 %v1874_v14  ;;  %v398_v53 = vcombine.high %v388_v50, %v388_v50  ;;  %1215 = vmatprep.mubr.bf16.mxu1 %v388_v50  ;;  %v395_v55 = vrot.slane %v367_v47, %v2149_v40  ;;  %v1903_v62 = vld [vmem:[%s2488_s2 + $0x158] sm:$0xff]   ;;  %v1907_v4 = vld [vmem:[%s2488_s2 + $0x160] sm:$0xff]   ;;  %v1915_v8 = vld [vmem:[%s2488_s2 + $0x188] sm:$0xff]  }
  0x12   :  { %1832 = vmatpush3.bf16.msra.mxu0 %v307_v16  ;;  %v1904_v2 = vld [vmem:[%s2488_s2 + $0x118] sm:$0xff]   ;;  %v1908_v7 = vld [vmem:[%s2488_s2 + $0x120] sm:$0xff]   ;;  %v1910_v9 = vld [vmem:[%s2488_s2 + $0x168] sm:$0xff]  }
  0x13   :  { %1682 = vmatprep.subr.bf16.mxu0 %v1876_v17  ;;  %v399_v6 = vcombine.high %v395_v55, %v395_v55  ;;  %v1917_v10 = vld [vmem:[%s2488_s2 + $0x1d0] sm:$0xff]   ;;  %v1912_v11 = vld [vmem:[%s2488_s2 + $0x128] sm:$0xff]   ;;  %v1921_v14 = vld [vmem:[%s2488_s2 + $0x1d8] sm:$0xff]  }
  0x14   :  { %1669 = vmatpush3.bf16.msra.mxu1 %v1875_v15  ;;  %v1919_v12 = vld [vmem:[%s2488_s2 + $0x190] sm:$0xff]   ;;  %v1922_v16 = vld [vmem:[%s2488_s2 + $0x198] sm:$0xff]   ;;  %v1927_v26 = vld [vmem:[%s2488_s2 + $0x248] sm:$0xff]  }
  0x15   :  { %1834 = vmatmul.mubr.msk.bf16.vlgmr.msra.gmra.mrb[0].mxu0 %vm301_vm2, %v264_v18  ;;  %1670 = vmatprep.subr.bf16.mxu1 %v1877_v19  ;;  %v1914_v13 = vld [vmem:[%s2488_s2 + $0x170] sm:$0xff]   ;;  %v1918_v17 = vld [vmem:[%s2488_s2 + $0x178] sm:$0xff]   ;;  %v1925_v18 = vld [vmem:[%s2488_s2 + $0x1e0] sm:$0xff]  }
  0x16   :  { %1683 = vmatpush3.bf16.msra.mxu0 %v1878_v20  ;;  %1255 = vmatprep.mubr.bf16.mxu0 %v398_v53  ;;  %v1916_v15 = vld [vmem:[%s2488_s2 + $0x130] sm:$0xff]   ;;  %v1920_v19 = vld [vmem:[%s2488_s2 + $0x138] sm:$0xff]   ;;  %v1926_v20 = vld [vmem:[%s2488_s2 + $0x1a0] sm:$0xff]  }
  0x17   :  { %1684 = vmatprep.subr.bf16.mxu0 %v1880_v22  ;;  %v1929_v22 = vld [vmem:[%s2488_s2 + $0x1e8] sm:$0xff]   ;;  %v1937_v31 = vld [vmem:[%s2488_s2 + $0x1f8] sm:$0xff]   ;;  %v1932_v32 = vld [vmem:[%s2488_s2 + $0x210] sm:$0xff]  }
  0x18   :  { %1671 = vmatpush3.bf16.msra.mxu1 %v1879_v21  ;;  %v1923_v21 = vld [vmem:[%s2488_s2 + $0x240] sm:$0xff]   ;;  %v1935_v34 = vld [vmem:[%s2488_s2 + $0x258] sm:$0xff]   ;;  %v1949_v45 = vld [vmem:[%s2488_s2 + $0x2d0] sm:$0xff]  }
  0x19   :  { %1672 = vmatprep.subr.bf16.mxu1 %v1881_v23  ;;  %v381_v23 = vrot.slane %v2159_v44, %v2149_v40  ;;  %v1941_v35 = vld [vmem:[%s2488_s2 + $0x2c0] sm:$0xff]   ;;  %v1942_v44 = vld [vmem:[%s2488_s2 + $0x268] sm:$0xff]   ;;  %v1951_v47 = vld [vmem:[%s2488_s2 + $0x290] sm:$0xff]  }
  0x1a   :  { %1685 = vmatpush3.bf16.msra.mxu0 %v1882_v24  ;;  %v1924_v24 = vld [vmem:[%s2488_s2 + $0x200] sm:$0xff]   ;;  %v1948_v53 = vld [vmem:[%s2488_s2 + $0x230] sm:$0xff]  }
  0x1b   :  { %1686 = vmatprep.subr.bf16.mxu0 %v1884_v27  ;;  %v1933_v27 = vld [vmem:[%s2488_s2 + $0x1f0] sm:$0xff]   ;;  %v397_v37 = vcombine.high %v381_v23, %v381_v23  ;;  %v1943_v38 = vld [vmem:[%s2488_s2 + $0x280] sm:$0xff]  }
  0x1c   :  { %1673 = vmatpush3.bf16.msra.mxu1 %v1883_v25  ;;  %v1930_v25 = vld [vmem:[%s2488_s2 + $0x1a8] sm:$0xff]   ;;  %v1940_v42 = vld [vmem:[%s2488_s2 + $0x220] sm:$0xff]  }
  0x1d   :  { %1674 = vmatprep.subr.bf16.mxu1 %v1885_v28  ;;  %v1928_v28 = vld [vmem:[%s2488_s2 + $0x208] sm:$0xff]  }
  0x1e   :  { %1687 = vmatpush3.bf16.msra.mxu0 %v1886_v29  ;;  %v1934_v29 = vld [vmem:[%s2488_s2 + $0x1b0] sm:$0xff]  }
  0x1f   :  { %1688 = vmatprep.subr.bf16.mxu0 %v1889_v33  ;;  %v1938_v33 = vld [vmem:[%s2488_s2 + $0x1b8] sm:$0xff]  }
  0x20   :  { %1675 = vmatpush3.bf16.msra.mxu1 %v1887_v30  ;;  %v1931_v30 = vld [vmem:[%s2488_s2 + $0x250] sm:$0xff]  }
  0x21   :  { %1704 = vmatprep.subr.bf16.mxu1 %v1891_v39  ;;  %v1939_v39 = vld [vmem:[%s2488_s2 + $0x260] sm:$0xff]  }
  0x22   :  { %1689 = vmatpush3.bf16.msra.mxu0 %v1890_v36  ;;  %v1936_v36 = vld [vmem:[%s2488_s2 + $0x218] sm:$0xff]  }
  0x23   :  { %1690 = vmatprep.subr.bf16.mxu0 %v1893_v41  ;;  %1216 = vmatmul.mubr.bf16.vlgmr.msra.gmra.mrb[0].mxu1 %v374_v48  ;;  %v1945_v41 = vld [vmem:[%s2488_s2 + $0x2c8] sm:$0xff]   ;;  %v1946_v48 = vld [vmem:[%s2488_s2 + $0x270] sm:$0xff]  }
  0x24   :  { %1705 = vmatpush3.bf16.msra.mxu1 %v1892_v49  ;;  %1295 = vmatprep.mubr.bf16.mxu1 %v395_v55  ;;  %v23_v49 = vld [vmem:[%s2486_s0 + $0x8] sm:$0x7f] }
  0x25   :  { %1706 = vmatprep.subr.bf16.mxu1 %v1895_v52  ;;  %v407_v50 = vrot.slane %v23_v49, %v2149_v40  ;;  %v400_v52 = vcombine.high %v23_v49, %v23_v49 }
  0x26   :  { %1691 = vmatpush3.bf16.msra.mxu0 %v1894_v43  ;;  %v1947_v43 = vld [vmem:[%s2488_s2 + $0x288] sm:$0xff]  }
  0x27   :  { %1692 = vmatprep.subr.bf16.mxu0 %v1897_v46  ;;  %v1944_v46 = vld [vmem:[%s2488_s2 + $0x228] sm:$0xff]   ;;  %v415_v55 = vcombine.high %v407_v50, %v407_v50 }
  0x28   :  { %1707 = vmatpush3.bf16.msra.mxu1 %v1896_v56  ;;  %v2350_v56 = vrot.slane %v400_v52, %v2149_v40 }
  0x29   :  { %1708 = vmatprep.subr.bf16.mxu1 %v1899_v58  ;;  %v437_v58 = vrot.slane %v415_v55, %v2149_v40 }
  0x2a   :  { %1693 = vmatpush3.bf16.msra.mxu0 %v1898_v51  ;;  %v1953_v51 = vld [vmem:[%s2488_s2 + $0x2d8] sm:$0xff]  }
  0x2b   :  { %1694 = vmatprep.subr.bf16.mxu0 %v1901_v54  ;;  %v1950_v54 = vld [vmem:[%s2488_s2 + $0x278] sm:$0xff]  }
  0x2c   :  { %1709 = vmatpush3.bf16.msra.mxu1 %v1900_v60  ;;  %v1952_v60 = vld [vmem:[%s2488_s2 + $0x238] sm:$0xff]  }
  0x2d   :  { %1710 = vmatprep.subr.bf16.mxu1 %v1903_v62  ;;  %v447_v62 = vcombine.high %v437_v58, %v437_v58 }
  0x2e   :  { %1695 = vmatpush3.bf16.msra.mxu0 %v1902_v57  ;;  %v1954_v57 = vld [vmem:[%s2488_s2 + $0x298] sm:$0xff]  }
  0x2f   :  { %1696 = vmatprep.subr.bf16.mxu0 %v1905_v59  ;;  %v1957_v59 = vld [vmem:[%s2488_s2 + $0x2e0] sm:$0xff]  }
  0x30   :  { %1711 = vmatpush3.bf16.msra.mxu1 %v1904_v2  ;;  %v1961_v2 = vld [vmem:[%s2488_s2 + $0x2e8] sm:$0xff]  }
  0x31   :  { %1712 = vmatprep.subr.bf16.mxu1 %v1907_v4  ;;  %v1956_v4 = vld [vmem:[%s2488_s2 + $0x300] sm:$0xff]  }
  0x32   :  { %1697 = vmatpush3.bf16.msra.mxu0 %v1906_v61  ;;  %v1955_v61 = vld [vmem:[%s2488_s2 + $0x340] sm:$0xff]  }
  0x33   :  { %1726 = vmatprep.subr.bf16.mxu0 %v1909_v63  ;;  %v416_v63 = vcombine.high %v2350_v56, %v2350_v56 }
  0x34   :  { %1713 = vmatpush3.bf16.msra.mxu1 %v1908_v7  ;;  %v1962_v7 = vld [vmem:[%s2488_s2 + $0x2a8] sm:$0xff]  }
  0x35   :  { %1256 = vmatmul.mubr.bf16.vlgmr.msra.gmra.mrb[4].mxu0 %v396_v0  ;;  %1714 = vmatprep.subr.bf16.mxu1 %v1910_v9  ;;  %v1958_v0 = vld [vmem:[%s2488_s2 + $0x2a0] sm:$0xff]   ;;  %v1960_v9 = vld [vmem:[%s2488_s2 + $0x308] sm:$0xff]  }
  0x36   :  { %1727 = vmatpush3.bf16.msra.mxu0 %v1911_v3  ;;  %1335 = vmatprep.mubr.bf16.mxu0 %v399_v6  ;;  %v423_v3 = vrot.slane %v407_v50, %v2149_v40  ;;  %v444_v6 = vrot.slane %v416_v63, %v2149_v40 }
  0x37   :  { %1728 = vmatprep.subr.bf16.mxu0 %v1913_v5  ;;  %v1959_v5 = vld [vmem:[%s2488_s2 + $0x348] sm:$0xff]  }
  0x38   :  { %1715 = vmatpush3.bf16.msra.mxu1 %v1912_v11  ;;  %v1966_v11 = vld [vmem:[%s2488_s2 + $0x2b0] sm:$0xff]  }
  0x39   :  { %1716 = vmatprep.subr.bf16.mxu1 %v1914_v13  ;;  %v1964_v13 = vld [vmem:[%s2488_s2 + $0x310] sm:$0xff]  }
  0x3a   :  { %1729 = vmatpush3.bf16.msra.mxu0 %v1915_v8  ;;  %v1965_v8 = vld [vmem:[%s2488_s2 + $0x2f0] sm:$0xff]  }
  0x3b   :  { %1730 = vmatprep.subr.bf16.mxu0 %v1917_v10  ;;  %v1963_v10 = vld [vmem:[%s2488_s2 + $0x350] sm:$0xff]  }
  0x3c   :  { %1717 = vmatpush3.bf16.msra.mxu1 %v1916_v15  ;;  %v1970_v15 = vld [vmem:[%s2488_s2 + $0x2b8] sm:$0xff]  }
  0x3d   :  { %1718 = vmatprep.subr.bf16.mxu1 %v1918_v17  ;;  %v1971_v17 = vld [vmem:[%s2488_s2 + $0x360] sm:$0xff]  }
  0x3e   :  { %1731 = vmatpush3.bf16.msra.mxu0 %v1919_v12  ;;  %v1969_v12 = vld [vmem:[%s2488_s2 + $0x2f8] sm:$0xff]  }
  0x3f   :  { %1732 = vmatprep.subr.bf16.mxu0 %v1921_v14  ;;  %v1967_v14 = vld [vmem:[%s2488_s2 + $0x358] sm:$0xff]  }
  0x40   :  { %1719 = vmatpush3.bf16.msra.mxu1 %v1920_v19  ;;  %v1974_v19 = vld [vmem:[%s2488_s2 + $0x380] sm:$0xff]  }
  0x41   :  { %1748 = vmatprep.subr.bf16.mxu1 %v1923_v21  ;;  %v1973_v21 = vld [vmem:[%s2488_s2 + $0x368] sm:$0xff]  }
  0x42   :  { %1733 = vmatpush3.bf16.msra.mxu0 %v1922_v16  ;;  %v1968_v16 = vld [vmem:[%s2488_s2 + $0x318] sm:$0xff]  }
  0x43   :  { %1734 = vmatprep.subr.bf16.mxu0 %v1925_v18  ;;  %1296 = vmatmul.mubr.bf16.vlgmr.msra.gmra.mrb[4].mxu1 %v381_v23  ;;  %v445_v18 = vcombine.high %v423_v3, %v423_v3  ;;  %v1975_v23 = vld [vmem:[%s2488_s2 + $0x328] sm:$0xff]  }
  0x44   :  { %1749 = vmatpush3.bf16.msra.mxu1 %v1924_v24  ;;  %1375 = vmatprep.mubr.bf16.mxu1 %v437_v58  ;;  %v1976_v24 = vld [vmem:[%s2488_s2 + $0x370] sm:$0xff]  }
  0x45   :  { %1750 = vmatprep.subr.bf16.mxu1 %v1927_v26 }
  0x46   :  { %1735 = vmatpush3.bf16.msra.mxu0 %v1926_v20  ;;  %v1972_v20 = vld [vmem:[%s2488_s2 + $0x320] sm:$0xff]  }
  0x47   :  { %1736 = vmatprep.subr.bf16.mxu0 %v1929_v22  ;;  %v1977_v22 = vld [vmem:[%s2488_s2 + $0x388] sm:$0xff]  }
  0x48   :  { %1751 = vmatpush3.bf16.msra.mxu1 %v1928_v28 }
  0x49   :  { %1752 = vmatprep.subr.bf16.mxu1 %v1931_v30 }
  0x4a   :  { %1737 = vmatpush3.bf16.msra.mxu0 %v1930_v25  ;;  %v1980_v25 = vld [vmem:[%s2488_s2 + $0x390] sm:$0xff]  }
  0x4b   :  { %1738 = vmatprep.subr.bf16.mxu0 %v1933_v27 }
  0x4c   :  { %1753 = vmatpush3.bf16.msra.mxu1 %v1932_v32 }
  0x4d   :  { %1754 = vmatprep.subr.bf16.mxu1 %v1935_v34 }
  0x4e   :  { %1739 = vmatpush3.bf16.msra.mxu0 %v1934_v29 }
  0x4f   :  { %1740 = vmatprep.subr.bf16.mxu0 %v1937_v31 }
  0x50   :  { %1755 = vmatpush3.bf16.msra.mxu1 %v1936_v36 }
  0x51   :  { %1756 = vmatprep.subr.bf16.mxu1 %v1939_v39 }
  0x52   :  { %1741 = vmatpush3.bf16.msra.mxu0 %v1938_v33 }
  0x53   :  { %1770 = vmatprep.subr.bf16.mxu0 %v1941_v35 }
  0x54   :  { %1757 = vmatpush3.bf16.msra.mxu1 %v1940_v42 }
  0x55   :  { %1336 = vmatmul.mubr.bf16.vlgmr.msra.gmra.mrb[8].mxu0 %v397_v37  ;;  %1758 = vmatprep.subr.bf16.mxu1 %v1942_v44 }
  0x56   :  { %1771 = vmatpush3.bf16.msra.mxu0 %v1943_v38  ;;  %1415 = vmatprep.mubr.bf16.mxu0 %v447_v62 }
  0x57   :  { %1772 = vmatprep.subr.bf16.mxu0 %v1945_v41 }
  0x58   :  { %1759 = vmatpush3.bf16.msra.mxu1 %v1944_v46 }
  0x59   :  { %1760 = vmatprep.subr.bf16.mxu1 %v1946_v48 }
  0x5a   :  { %1773 = vmatpush3.bf16.msra.mxu0 %v1947_v43 }
  0x5b   :  { %1774 = vmatprep.subr.bf16.mxu0 %v1949_v45 }
  0x5c   :  { %1761 = vmatpush3.bf16.msra.mxu1 %v1948_v53 }
  0x5d   :  { %1762 = vmatprep.subr.bf16.mxu1 %v1950_v54 }
  0x5e   :  { %1775 = vmatpush3.bf16.msra.mxu0 %v1951_v47 }
  0x5f   :  { %1776 = vmatprep.subr.bf16.mxu0 %v1953_v51 }
  0x60   :  { %1763 = vmatpush3.bf16.msra.mxu1 %v1952_v60 }
  0x61   :  { %1792 = vmatprep.subr.bf16.mxu1 %v1955_v61 }
  0x62   :  { %1777 = vmatpush3.bf16.msra.mxu0 %v1954_v57 }
  0x63   :  { %1778 = vmatprep.subr.bf16.mxu0 %v1957_v59  ;;  %1376 = vmatmul.mubr.bf16.vlgmr.msra.gmra.mrb[8].mxu1 %v423_v3 }
  0x64   :  { %1793 = vmatpush3.bf16.msra.mxu1 %v1956_v4  ;;  %1455 = vmatprep.mubr.bf16.mxu1 %v444_v6 }
  0x65   :  { %1794 = vmatprep.subr.bf16.mxu1 %v1959_v5 }
  0x66   :  { %1779 = vmatpush3.bf16.msra.mxu0 %v1958_v0 }
  0x67   :  { %1780 = vmatprep.subr.bf16.mxu0 %v1961_v2 }
  0x68   :  { %1795 = vmatpush3.bf16.msra.mxu1 %v1960_v9 }
  0x69   :  { %1796 = vmatprep.subr.bf16.mxu1 %v1963_v10 }
  0x6a   :  { %1781 = vmatpush3.bf16.msra.mxu0 %v1962_v7 }
  0x6b   :  { %1782 = vmatprep.subr.bf16.mxu0 %v1965_v8 }
  0x6c   :  { %1797 = vmatpush3.bf16.msra.mxu1 %v1964_v13 }
  0x6d   :  { %1798 = vmatprep.subr.bf16.mxu1 %v1967_v14 }
  0x6e   :  { %1783 = vmatpush3.bf16.msra.mxu0 %v1966_v11 }
  0x6f   :  { %1784 = vmatprep.subr.bf16.mxu0 %v1969_v12 }
  0x70   :  { %1799 = vmatpush3.bf16.msra.mxu1 %v1968_v16 }
  0x71   :  { %1800 = vmatprep.subr.bf16.mxu1 %v1971_v17 }
  0x72   :  { %1785 = vmatpush3.bf16.msra.mxu0 %v1970_v15 }
  0x73   :  { %1837 = vmatprep.subr.bf16.mxu0 %v2012_v1 }
  0x74   :  { %1801 = vmatpush3.bf16.msra.mxu1 %v1972_v20 }
  0x75   :  { %1416 = vmatmul.mubr.bf16.vlgmr.msra.gmra.mrb[12].mxu0 %v445_v18  ;;  %1802 = vmatprep.subr.bf16.mxu1 %v1973_v21 }
  0x76   :  { %1838 = vmatpush3.bf16.msra.mxu0 %v1974_v19  ;;  %1853 = vmatprep.mubr.msk.bf16.mxu0 %vm2013_vm0, %v2012_v1 }
  0x77   :  { %1839 = vmatprep.subr.bf16.mxu0 %v2012_v1 }
  0x7a   :  { %1840 = vmatpush3.bf16.msra.mxu0 %v1977_v22 }
  0x7b   :  { %1841 = vmatprep.subr.bf16.mxu0 %v2012_v1 }
  0x7c   :  { %10 = vsyncpa [#allocation3], 0  ;;  %1803 = vmatpush3.bf16.msra.mxu1 %v1975_v23  ;;  %v1978_v26 = vld [vmem:[%s2488_s2 + $0x330] sm:$0xff]   ;;  %v1979_v27 = vld [vmem:[%s2488_s2 + $0x378] sm:$0xff]   ;;  %v430_v31 = vrot.slane %v2350_v56, %v2149_v40  ;;  %s2015_s30 = smov [#allocation2]   ;;  %vm1511_vm3 = vcmask 33792  }
  0x7d   :  { %1804 = vmatprep.subr.bf16.mxu1 %v1976_v24  ;;  %v1983_v28 = vld [vmem:[%s2488_s2 + $0x398] sm:$0xff]   ;;  %v1984_v30 = vld [vmem:[%s2488_s2 + $0x3a0] sm:$0xff]   ;;  %v1985_v32 = vld [vmem:[%s2488_s2 + $0x3a8] sm:$0xff]   ;;  %s1519_s6 = sshll.u32 %s2015_s30, 4  ;;  %s1520_s6 = int_to_ptr.vmem [resolvable:$true] %s1519_s6 }
  0x7e   :  { %1842 = vmatpush3.bf16.msra.mxu0 %v1980_v25  ;;  %v1981_v29 = vld [vmem:[%s2488_s2 + $0x338] sm:$0xff]   ;;  %v1986_v33 = vld [vmem:[%s2488_s2 + $0x3b0] sm:$0xff]   ;;  %v446_v34 = vcombine.high %v430_v31, %v430_v31  ;;  %v1653_v19 = vld [vmem:[%s2490_s4] ss:$0 sm:$0xff]  ;;  %s1988_s7 = scalar_lea.vmem %s1520_s6, 32  ;;  %p1993_p1 = scmp.lt.s32.totalorder %s1520_s6, %s1520_s6 }
  0x7f   :  { %1843 = vmatprep.subr.bf16.mxu0 %v2012_v1  ;;  %v1987_v40 = vld [vmem:[%s2488_s2 + $0x3b8] sm:$0xff]   ;;  %p1989_p0 = scmp.ne.s32.totalorder %s1520_s6, %s1988_s7  ;;  %p1994_p2 = scmp.lt.s32.totalorder %s1988_s7, %s1988_s7 }
  0x80   :  { %1805 = vmatpush3.bf16.msra.mxu1 %v1978_v26 }
  0x81   :  { %1806 = vmatprep.subr.bf16.mxu1 %v1979_v27  ;;  %p1995_p3 = por %p1994_p2, %p1993_p1 }
  0x82   :  { %1844 = vmatpush3.bf16.msra.mxu0 %v1983_v28 }
  0x83   :  { %1845 = vmatprep.subr.bf16.mxu0 %v2012_v1  ;;  %p1996_p4 = pnand %p1995_p3, %p1989_p0 }
  0x84   :  { %1807 = vmatpush3.bf16.msra.mxu1 %v1981_v29 }
  0x86   :  { %1846 = vmatpush3.bf16.msra.mxu0 %v1984_v30 }
  0x87   :  { %1847 = vmatprep.subr.bf16.mxu0 %v2012_v1  ;;  %1456 = vmatmul.mubr.bf16.vlgmr.msra.gmra.mrb[12].mxu1 %v430_v31 }
  0x8a   :  { %1848 = vmatpush3.bf16.msra.mxu0 %v1985_v32 }
  0x8b   :  { %1849 = vmatprep.subr.bf16.mxu0 %v2012_v1 }
  0x8e   :  { %1850 = vmatpush3.bf16.msra.mxu0 %v1986_v33 }
  0x8f   :  { %1851 = vmatprep.subr.bf16.mxu0 %v2012_v1 }
  0x92   :  { %1852 = vmatpush3.bf16.msra.mxu0 %v1987_v40 }
  0x95   :  { %1854 = vmatmul.mubr.bf16.vlgmr.msra.gmra.mrb[16].mxu0 %v446_v34 }
  0xe8   :  { %v343_v35 = vpop.f32.mrb[0].mxu0 }
  0xe9   :  { %v1835_v36 = vpop.f32.mrb[1].mxu0 }
  0xea   :  { %v346_v37 = vpop.f32.mrb[2].mxu0 }
  0xeb   :  { %v1836_v38 = vpop.f32.mrb[3].mxu0 }
  0xf6   :  { %v1676_v39 = vpop.f32.mrb[0].mxu1 }
  0xf7   :  { %v1677_v41 = vpop.f32.mrb[1].mxu1 }
  0xf8   :  { %v1678_v42 = vadd.f32 %v1677_v41, %v1676_v39  ;;  %v1679_v43 = vpop.f32.mrb[2].mxu1 }
  0xf9   :  { %v1680_v44 = vpop.f32.mrb[3].mxu1 }
  0xfa   :  { %v1218_v45 = vadd.f32 %v1678_v42, %v343_v35 }
 0x108   :  { %v1698_v46 = vpop.f32.mrb[4].mxu0 }
 0x109   :  { %v1699_v47 = vpop.f32.mrb[5].mxu0 }
 0x10a   :  { %v1700_v48 = vadd.f32 %v1699_v47, %v1698_v46  ;;  %v1701_v49 = vpop.f32.mrb[6].mxu0 }
 0x10b   :  { %v1702_v50 = vpop.f32.mrb[7].mxu0 }
 0x10c   :  { %v1258_v51 = vadd.f32 %v1700_v48, %v1218_v45 }
 0x116   :  { %v1720_v1 = vpop.f32.mrb[4].mxu1 }
 0x117   :  { %v1721_v52 = vpop.f32.mrb[5].mxu1 }
 0x118   :  { %v1722_v53 = vadd.f32 %v1721_v52, %v1720_v1  ;;  %v1723_v54 = vpop.f32.mrb[6].mxu1 }
 0x119   :  { %v1724_v55 = vpop.f32.mrb[7].mxu1 }
 0x11a   :  { %v1298_v56 = vadd.f32 %v1722_v53, %v1258_v51 }
 0x128   :  { %v1742_v57 = vpop.f32.mrb[8].mxu0 }
 0x129   :  { %v1743_v58 = vpop.f32.mrb[9].mxu0 }
 0x12a   :  { %v1744_v59 = vadd.f32 %v1743_v58, %v1742_v57  ;;  %v1745_v60 = vpop.f32.mrb[10].mxu0 }
 0x12b   :  { %v1746_v61 = vpop.f32.mrb[11].mxu0 }
 0x12c   :  { %v1338_v62 = vadd.f32 %v1744_v59, %v1298_v56 }
 0x136   :  { %v1764_v63 = vpop.f32.mrb[8].mxu1 }
 0x137   :  { %v1765_v0 = vpop.f32.mrb[9].mxu1 }
 0x138   :  { %v1766_v2 = vadd.f32 %v1765_v0, %v1764_v63  ;;  %v1767_v3 = vpop.f32.mrb[10].mxu1 }
 0x139   :  { %v1768_v4 = vpop.f32.mrb[11].mxu1 }
 0x13a   :  { %v1378_v5 = vadd.f32 %v1766_v2, %v1338_v62 }
 0x148   :  { %v1786_v6 = vpop.f32.mrb[12].mxu0 }
 0x149   :  { %v1787_v7 = vpop.f32.mrb[13].mxu0 }
 0x14a   :  { %v1788_v8 = vadd.f32 %v1787_v7, %v1786_v6  ;;  %v1789_v9 = vpop.f32.mrb[14].mxu0 }
 0x14b   :  { %v1790_v10 = vpop.f32.mrb[15].mxu0 }
 0x14c   :  { %v1418_v11 = vadd.f32 %v1788_v8, %v1378_v5 }
 0x15a   :  { %v1808_v12 = vpop.f32.mrb[12].mxu1 }
 0x15b   :  { %v1809_v13 = vpop.f32.mrb[13].mxu1 }
 0x15c   :  { %v1810_v14 = vadd.f32 %v1809_v13, %v1808_v12  ;;  %v1811_v15 = vpop.f32.mrb[14].mxu1 }
 0x15d   :  { %v1812_v16 = vpop.f32.mrb[15].mxu1 }
 0x15e   :  { %v1458_v17 = vadd.f32 %v1810_v14, %v1418_v11 }
 0x168   :  { %v1497_v18 = vpop.f32.mrb[16].mxu0 }
 0x169   :  { %v1498_v20 = vadd.f32 %v1497_v18, %v1458_v17  ;;  %v1855_v21 = vpop.f32.mrb[17].mxu0 }
 0x16a   :  { %v1500_v22 = vpop.f32.mrb[18].mxu0 }
 0x16b   :  { %v1510_v23 = vadd.f32 %v1653_v19, %v1498_v20  ;;  %v1856_v24 = vpop.f32.mrb[19].mxu0 }
 0x16d   :  { %1512 = vst.msk [vmem:[#allocation2] sm:$0x3] %vm1511_vm3, %v1510_v23 }
 0x16e   :  { %1999 = shalt.err (!%p1996_p4)
}
 0x16f   :  { %s2000_s4 = scalar_lea.hbm %s2491_s5, 32 }
 0x170   :  { %p2001_p5 = scmp.ne.s32.totalorder %s2491_s5, %s2000_s4  ;;  %p2004_p6 = scmp.lt.u32.totalorder %s2000_s4, %s2491_s5 }
 0x172   :  { %p2006_p7 = pnand %p2004_p6, %p2001_p5 }
 0x174   :  { %2009 = shalt.err (!%p2006_p7)
}
 0x175   :  { %1522 = dma.vmem_to_hbm [thread:$0]  %s1520_s6, 32, %s2491_s5, [#allocation3]  }
 0x176   :  { %2010 = dma.done.wait [#allocation3], 32  }
 0x177   :  { %2011 = vsyncadd [#allocation3], 4294967264 }
 0x178   :  { %1526 = vsyncpa [#allocation3], 1 }

</bundles_post_ra>
